<compile_context>
chip_gen: v7x
topology: tpu7x:2x2x1
jax: 0.10.0
libtpu: 0.0.40
codegen_flags: <defaults>
</compile_context>

<pallas_src>
import functools

import jax
import jax.numpy as jnp
from jax.experimental import pallas as pl
from jax.experimental.pallas import tpu as pltpu


def _round_up(x: int, m: int) -> int:
    return (x + m - 1) // m * m


def _cdiv(a: int, b: int) -> int:
    return (a + b - 1) // b


def _autoencoder_kernel(x_ref, w1_ref, b1_ref, w2_ref, b2_ref, enc_ref, dec_ref):
    # Encoder: Linear(input -> hidden) + ReLU.  MXU matmul, f32 accumulation.
    x = x_ref[...].astype(w1_ref.dtype)          # in-kernel cast to the compute dtype
    h = jnp.dot(x, w1_ref[...], preferred_element_type=jnp.float32) + b1_ref[...]
    encoded = jnp.maximum(h, 0.0)
    enc_ref[...] = encoded.astype(enc_ref.dtype)

    # Decoder: Linear(hidden -> input) + Sigmoid.
    d = jnp.dot(encoded.astype(w2_ref.dtype), w2_ref[...],
                preferred_element_type=jnp.float32) + b2_ref[...]
    # sigmoid(d) = 1 / (1 + exp(-d)); exp and the approx reciprocal both run on the
    # EUP slot, keeping VALU cycles free on large TB x Dp tiles.
    dec_ref[...] = pl.reciprocal(1.0 + jnp.exp(-d), approx=True).astype(dec_ref.dtype)


def _plan_tiling(B, D, H, block_rows, compute_dtype):
    """Derive padded dims, batch tile and VMEM limits from the hardware budget."""
    kind = jax.devices()[0].device_kind.lower()
    is_v7 = ("v7" in kind) or ("7x" in kind)
    mxu256 = is_v7 or ("v6" in kind)
    if is_v7:
        vmem_budget = 56 * 1024 * 1024        # 64 MiB physical per TC; leave headroom
    elif ("v5" in kind) or ("v6" in kind):
        vmem_budget = 110 * 1024 * 1024       # 128 MiB physical
    else:
        vmem_budget = 32 * 1024 * 1024        # conservative for older/unknown chips

    def _align_feat(n):
        # v6e/v7x MXUs are 2x256x256: use 256-aligned K/N when the dim is big enough.
        return _round_up(n, 256) if (mxu256 and n >= 256) else _round_up(n, 128)

    Dp = _align_feat(D)
    Hp = _align_feat(H)
    cbytes = jnp.dtype(compute_dtype).itemsize

    # Footprints (bytes).  Weights counted single-buffered (constant block index).
    w_bytes = 2 * Dp * Hp * cbytes + (Hp + Dp) * 4
    per_row = (2 * Dp * 4            # x tile (conservatively f32), double buffered
               + 2 * Hp * 4          # encoded output tile (f32), double buffered
               + 2 * Dp * 4          # decoded output tile (f32), double buffered
               + (Hp + Dp) * 4       # h / d f32 temporaries
               + Hp * cbytes)        # encoded cast for the second matmul
    slack = 4 * 1024 * 1024
    tb_max = max(8, ((vmem_budget - w_bytes - slack) // per_row) // 8 * 8)
    # TODO(synk): when weights exceed the VMEM budget even single-buffered (very large
    # D*H), switch to a K-tiled grid with a VMEM f32 accumulator instead of this path.

    if block_rows is None:
        block_rows = 256 if is_v7 else 1024
    block_rows = min(max(8, _round_up(block_rows, 8)), tb_max)

    # Bound batch-padding waste (<8 rows/tile) and, on v7x, guarantee >=2 grid steps
    # so the "parallel" batch axis can shard across both TensorCores.
    min_steps = 2 if (is_v7 and B >= 16) else 1
    nt = max(min_steps, _cdiv(B, block_rows))
    TB = min(block_rows, _round_up(_cdiv(B, nt), 8))
    Bp = nt * TB

    def _limit(weight_buffers):
        used = (weight_buffers * 2 * Dp * Hp * cbytes + 2 * (Hp + Dp) * 4
                + TB * per_row + 8 * 1024 * 1024)
        return int(max(16 * 1024 * 1024, min(vmem_budget, used)))

    return dict(TB=TB, Bp=Bp, Dp=Dp, Hp=Hp,
                vmem_limit_sb=_limit(1), vmem_limit_db=_limit(2))


@functools.partial(
    jax.jit,
    static_argnames=("TB", "Bp", "Dp", "Hp", "vmem_limit",
                     "single_buffer_weights", "compute_dtype"))
def _forward_impl(x, w1, b1, w2, b2, *, TB, Bp, Dp, Hp, vmem_limit,
                  single_buffer_weights, compute_dtype):
    B, D = x.shape
    H = w1.shape[1]
    cdt = jnp.dtype(compute_dtype)
    b1 = jnp.reshape(b1, (1, -1))
    b2 = jnp.reshape(b2, (1, -1))

    # Pad / cast only when needed -- each pad is an extra HBM pass outside the kernel.
    if (Bp, Dp) == (B, D):
        x_p = x                                        # kernel casts to compute dtype
    else:
        x_p = jnp.zeros((Bp, Dp), cdt).at[:B, :D].set(x.astype(cdt))
    # TODO(synk): cache padded/cast weights across calls (close over them) instead of
    # re-materializing them on every forward.
    if (Dp, Hp) == (D, H) and w1.dtype == cdt:
        w1_p = w1
    else:
        w1_p = jnp.zeros((Dp, Hp), cdt).at[:D, :H].set(w1.astype(cdt))
    if (Hp, Dp) == (H, D) and w2.dtype == cdt:
        w2_p = w2
    else:
        w2_p = jnp.zeros((Hp, Dp), cdt).at[:H, :D].set(w2.astype(cdt))
    if Hp == H and b1.dtype == jnp.float32:
        b1_p = b1
    else:
        b1_p = jnp.zeros((1, Hp), jnp.float32).at[:, :H].set(b1.astype(jnp.float32))
    if Dp == D and b2.dtype == jnp.float32:
        b2_p = b2
    else:
        b2_p = jnp.zeros((1, Dp), jnp.float32).at[:, :D].set(b2.astype(jnp.float32))

    # Weights/biases use a constant block index -> fetched once, VMEM-resident.
    # Single buffering halves their VMEM footprint (the block never changes).
    wkw = {"pipeline_mode": pl.Buffered(1)} if single_buffer_weights else {}
    in_specs = [
        pl.BlockSpec((TB, Dp), lambda i: (i, 0)),          # batch-tiled activations
        pl.BlockSpec((Dp, Hp), lambda i: (0, 0), **wkw),
        pl.BlockSpec((1, Hp), lambda i: (0, 0), **wkw),
        pl.BlockSpec((Hp, Dp), lambda i: (0, 0), **wkw),
        pl.BlockSpec((1, Dp), lambda i: (0, 0), **wkw),
    ]

    enc_p, dec_p = pl.pallas_call(
        _autoencoder_kernel,
        out_shape=(
            jax.ShapeDtypeStruct((Bp, Hp), jnp.float32),
            jax.ShapeDtypeStruct((Bp, Dp), jnp.float32),
        ),
        grid=(Bp // TB,),
        in_specs=in_specs,
        out_specs=(
            pl.BlockSpec((TB, Hp), lambda i: (i, 0)),
            pl.BlockSpec((TB, Dp), lambda i: (i, 0)),
        ),
        compiler_params=pltpu.CompilerParams(
            dimension_semantics=("parallel",),   # batch tiles are independent
            vmem_limit_bytes=vmem_limit,
        ),
    )(x_p, w1_p, b1_p, w2_p, b2_p)

    # Strip padding (padded hidden lanes are 0, padded decoded lanes are 0.5,
    # padded batch rows are discarded).
    return enc_p[:B, :H], dec_p[:B, :D]


def autoencoder_forward(x, w1, b1, w2, b2, *, block_rows=None,
                        compute_dtype=jnp.bfloat16):
    """Full autoencoder forward pass as one batch-tiled Pallas kernel.

    x  : (B, input_size)
    w1 : (input_size, hidden_size), b1 : (1, hidden_size) or (hidden_size,)
    w2 : (hidden_size, input_size), b2 : (1, input_size)  or (input_size,)
    returns (encoded (B, hidden_size) f32, decoded (B, input_size) f32),
    matching torch: encoded = relu(x @ w1 + b1); decoded = sigmoid(encoded @ w2 + b2).

    compute_dtype controls MXU operand dtype (bf16 default, f32 accumulation always);
    pass jnp.float32 for a near-bit-accurate path.  For strict bit-parity against an
    f32 reference, also pin the matmul precision identically on both sides.
    """
    B, D = x.shape
    H = w1.shape[1]
    plan = _plan_tiling(B, D, H, block_rows, compute_dtype)
    common = dict(TB=plan["TB"], Bp=plan["Bp"], Dp=plan["Dp"], Hp=plan["Hp"],
                  compute_dtype=jnp.dtype(compute_dtype))
    try:
        return _forward_impl(x, w1, b1, w2, b2, single_buffer_weights=True,
                             vmem_limit=plan["vmem_limit_sb"], **common)
    except Exception:
        # jax version without BlockSpec(pipeline_mode=...): fall back to default
        # double buffering, with the VMEM limit re-derived for 2x weight buffers.
        return _forward_impl(x, w1, b1, w2, b2, single_buffer_weights=False,
                             vmem_limit=plan["vmem_limit_db"], **common)


def _reference(x, w1, b1, w2, b2):
    enc = jnp.maximum(x @ w1 + jnp.reshape(b1, (1, -1)), 0.0)
    dec = jax.nn.sigmoid(enc @ w2 + jnp.reshape(b2, (1, -1)))
    return enc, dec


if __name__ == "__main__":
    key = jax.random.PRNGKey(0)
    B, input_size, hidden_size = 16, 64, 32

    kx, k1, k2, k3, k4 = jax.random.split(key, 5)
    x = jax.random.normal(kx, (B, input_size), dtype=jnp.float32)

    # Deterministic parameter init (uniform, roughly matching nn.Linear's scale).
    bound1 = 1.0 / (input_size ** 0.5)
    w1 = jax.random.uniform(k1, (input_size, hidden_size), jnp.float32, -bound1, bound1)
    b1 = jax.random.uniform(k2, (1, hidden_size), jnp.float32, -bound1, bound1)
    bound2 = 1.0 / (hidden_size ** 0.5)
    w2 = jax.random.uniform(k3, (hidden_size, input_size), jnp.float32, -bound2, bound2)
    b2 = jax.random.uniform(k4, (1, input_size), jnp.float32, -bound2, bound2)

    enc_ref, dec_ref = _reference(x, w1, b1, w2, b2)

    # Default path: bf16 MXU operands, f32 accumulation, f32 outputs.
    enc_bf, dec_bf = autoencoder_forward(x, w1, b1, w2, b2)
    jax.block_until_ready((enc_bf, dec_bf))
    assert enc_bf.shape == (B, hidden_size) and dec_bf.shape == (B, input_size)
    assert jnp.allclose(enc_bf, enc_ref, atol=5e-2, rtol=5e-2)
    assert jnp.allclose(dec_bf, dec_ref, atol=5e-2, rtol=5e-2)

    # f32 MXU path.  Tolerances stay moderate: the XLA reference and the Pallas
    # kernel may resolve the default f32 matmul precision differently, and the
    # decoder additionally absorbs the approx-reciprocal error of the sigmoid.
    enc_f32, dec_f32 = autoencoder_forward(x, w1, b1, w2, b2,
                                           compute_dtype=jnp.float32)
    jax.block_until_ready((enc_f32, dec_f32))
    assert jnp.allclose(enc_f32, enc_ref, atol=2e-2, rtol=1e-2)
    assert jnp.allclose(dec_f32, dec_ref, atol=2e-2, rtol=1e-2)

    print("KERNEL_OK")
</pallas_src>

<mosaic_0001>
module attributes {stable_mosaic.version = 11 : i64} {
  func.func @_autoencoder_kernel(%arg0: i32, %arg1: memref<16x128xbf16, #tpu.memory_space<vmem>>, %arg2: memref<128x128xbf16, #tpu.memory_space<vmem>>, %arg3: memref<1x128xf32, #tpu.memory_space<vmem>>, %arg4: memref<128x128xbf16, #tpu.memory_space<vmem>>, %arg5: memref<1x128xf32, #tpu.memory_space<vmem>>, %arg6: memref<16x128xf32, #tpu.memory_space<vmem>>, %arg7: memref<16x128xf32, #tpu.memory_space<vmem>>) attributes {dimension_semantics = [#tpu.dimension_semantics<parallel>], iteration_bounds = array<i64: 1>, scalar_prefetch = 0 : i64, scratch_operands = 0 : i64, tpu.core_type = #tpu.core_type<tc>, window_params = [{transform_indices = @transform_0, window_bounds = array<i64: 16, 128>}, {pipeline_mode = #tpu.pipeline_mode<synchronous>, transform_indices = @transform_1, window_bounds = array<i64: 128, 128>}, {pipeline_mode = #tpu.pipeline_mode<synchronous>, transform_indices = @transform_2, window_bounds = array<i64: 1, 128>}, {pipeline_mode = #tpu.pipeline_mode<synchronous>, transform_indices = @transform_3, window_bounds = array<i64: 128, 128>}, {pipeline_mode = #tpu.pipeline_mode<synchronous>, transform_indices = @transform_4, window_bounds = array<i64: 1, 128>}, {transform_indices = @transform_5, window_bounds = array<i64: 16, 128>}, {transform_indices = @transform_6, window_bounds = array<i64: 16, 128>}]} {
    %c0 = arith.constant 0 : index
    %c0_0 = arith.constant 0 : index
    %0 = vector.load %arg1[%c0, %c0_0] : memref<16x128xbf16, #tpu.memory_space<vmem>>, vector<16x128xbf16>
    %c0_1 = arith.constant 0 : index
    %c0_2 = arith.constant 0 : index
    %1 = vector.load %arg2[%c0_1, %c0_2] : memref<128x128xbf16, #tpu.memory_space<vmem>>, vector<128x128xbf16>
    %cst = arith.constant dense<0.000000e+00> : vector<16x128xf32>
    %2 = tpu.matmul %0, %1, %cst {dimension_numbers = #tpu.dot_dimension_numbers<[1], [0], [0], [1], [0, 0, 1, 1], [], []>} : vector<16x128xbf16>, vector<128x128xbf16>, vector<16x128xf32> -> vector<16x128xf32>
    %c0_3 = arith.constant 0 : index
    %c0_4 = arith.constant 0 : index
    %3 = vector.load %arg3[%c0_3, %c0_4] : memref<1x128xf32, #tpu.memory_space<vmem>>, vector<1x128xf32>
    %4 = vector.broadcast %3 : vector<1x128xf32> to vector<16x128xf32>
    %5 = arith.addf %2, %4 : vector<16x128xf32>
    %cst_5 = arith.constant 0.000000e+00 : f32
    %6 = vector.broadcast %cst_5 : f32 to vector<16x128xf32>
    %7 = arith.maximumf %5, %6 : vector<16x128xf32>
    %c0_6 = arith.constant 0 : index
    %c0_7 = arith.constant 0 : index
    %8 = vector.load %arg6[%c0_6, %c0_7] : memref<16x128xf32, #tpu.memory_space<vmem>>, vector<16x128xf32>
    tpu.vector_store %arg6[%c0_6, %c0_7], %7 {strides = array<i32>} : memref<16x128xf32, #tpu.memory_space<vmem>>, vector<16x128xf32>,
    %9 = arith.truncf %7 : vector<16x128xf32> to vector<16x128xbf16>
    %c0_8 = arith.constant 0 : index
    %c0_9 = arith.constant 0 : index
    %10 = vector.load %arg4[%c0_8, %c0_9] : memref<128x128xbf16, #tpu.memory_space<vmem>>, vector<128x128xbf16>
    %cst_10 = arith.constant dense<0.000000e+00> : vector<16x128xf32>
    %11 = tpu.matmul %9, %10, %cst_10 {dimension_numbers = #tpu.dot_dimension_numbers<[1], [0], [0], [1], [0, 0, 1, 1], [], []>} : vector<16x128xbf16>, vector<128x128xbf16>, vector<16x128xf32> -> vector<16x128xf32>
    %c0_11 = arith.constant 0 : index
    %c0_12 = arith.constant 0 : index
    %12 = vector.load %arg5[%c0_11, %c0_12] : memref<1x128xf32, #tpu.memory_space<vmem>>, vector<1x128xf32>
    %13 = vector.broadcast %12 : vector<1x128xf32> to vector<16x128xf32>
    %14 = arith.addf %11, %13 : vector<16x128xf32>
    %cst_13 = arith.constant 0.000000e+00 : f32
    %15 = vector.broadcast %cst_13 : f32 to vector<16x128xf32>
    %16 = arith.subf %15, %14 : vector<16x128xf32>
    %17 = math.exp %16 : vector<16x128xf32>
    %cst_14 = arith.constant 1.000000e+00 : f32
    %18 = vector.broadcast %cst_14 : f32 to vector<16x128xf32>
    %19 = arith.addf %18, %17 : vector<16x128xf32>
    %20 = tpu.reciprocal %19 {approx = true} : vector<16x128xf32> -> vector<16x128xf32>
    %c0_15 = arith.constant 0 : index
    %c0_16 = arith.constant 0 : index
    %21 = vector.load %arg7[%c0_15, %c0_16] : memref<16x128xf32, #tpu.memory_space<vmem>>, vector<16x128xf32>
    tpu.vector_store %arg7[%c0_15, %c0_16], %20 {strides = array<i32>} : memref<16x128xf32, #tpu.memory_space<vmem>>, vector<16x128xf32>,
    return
  }
  func.func @transform_0(%arg0: i32) -> (i32, i32) {
    %c0_i32 = arith.constant 0 : i32
    %c0_i32_0 = arith.constant 0 : i32
    return %arg0, %c0_i32 : i32, i32
  }
  func.func @transform_1(%arg0: i32) -> (i32, i32) {
    %c0_i32 = arith.constant 0 : i32
    %c0_i32_0 = arith.constant 0 : i32
    %c0_i32_1 = arith.constant 0 : i32
    return %c0_i32, %c0_i32_0 : i32, i32
  }
  func.func @transform_2(%arg0: i32) -> (i32, i32) {
    %c0_i32 = arith.constant 0 : i32
    %c0_i32_0 = arith.constant 0 : i32
    %c0_i32_1 = arith.constant 0 : i32
    return %c0_i32, %c0_i32_0 : i32, i32
  }
  func.func @transform_3(%arg0: i32) -> (i32, i32) {
    %c0_i32 = arith.constant 0 : i32
    %c0_i32_0 = arith.constant 0 : i32
    %c0_i32_1 = arith.constant 0 : i32
    return %c0_i32, %c0_i32_0 : i32, i32
  }
  func.func @transform_4(%arg0: i32) -> (i32, i32) {
    %c0_i32 = arith.constant 0 : i32
    %c0_i32_0 = arith.constant 0 : i32
    %c0_i32_1 = arith.constant 0 : i32
    return %c0_i32, %c0_i32_0 : i32, i32
  }
  func.func @transform_5(%arg0: i32) -> (i32, i32) {
    %c0_i32 = arith.constant 0 : i32
    %c0_i32_0 = arith.constant 0 : i32
    return %arg0, %c0_i32 : i32, i32
  }
  func.func @transform_6(%arg0: i32) -> (i32, i32) {
    %c0_i32 = arith.constant 0 : i32
    %c0_i32_0 = arith.constant 0 : i32
    return %arg0, %c0_i32 : i32, i32
  }
}

module attributes {stable_mosaic.version = 11 : i64} {
  func.func @_autoencoder_kernel(%arg0: i32, %arg1: memref<16x128xbf16, #tpu.memory_space<vmem>>, %arg2: memref<128x128xbf16, #tpu.memory_space<vmem>>, %arg3: memref<1x128xf32, #tpu.memory_space<vmem>>, %arg4: memref<128x128xbf16, #tpu.memory_space<vmem>>, %arg5: memref<1x128xf32, #tpu.memory_space<vmem>>, %arg6: memref<16x128xf32, #tpu.memory_space<vmem>>, %arg7: memref<16x128xf32, #tpu.memory_space<vmem>>) attributes {dimension_semantics = [#tpu.dimension_semantics<parallel>], iteration_bounds = array<i64: 1>, scalar_prefetch = 0 : i64, scratch_operands = 0 : i64, tpu.core_type = #tpu.core_type<tc>, window_params = [{transform_indices = @transform_0, window_bounds = array<i64: 16, 128>}, {pipeline_mode = #tpu.pipeline_mode<synchronous>, transform_indices = @transform_1, window_bounds = array<i64: 128, 128>}, {pipeline_mode = #tpu.pipeline_mode<synchronous>, transform_indices = @transform_2, window_bounds = array<i64: 1, 128>}, {pipeline_mode = #tpu.pipeline_mode<synchronous>, transform_indices = @transform_3, window_bounds = array<i64: 128, 128>}, {pipeline_mode = #tpu.pipeline_mode<synchronous>, transform_indices = @transform_4, window_bounds = array<i64: 1, 128>}, {transform_indices = @transform_5, window_bounds = array<i64: 16, 128>}, {transform_indices = @transform_6, window_bounds = array<i64: 16, 128>}]} {
    %c0 = arith.constant 0 : index
    %c0_0 = arith.constant 0 : index
    %0 = vector.load %arg1[%c0, %c0_0] : memref<16x128xbf16, #tpu.memory_space<vmem>>, vector<16x128xbf16>
    %c0_1 = arith.constant 0 : index
    %c0_2 = arith.constant 0 : index
    %1 = vector.load %arg2[%c0_1, %c0_2] : memref<128x128xbf16, #tpu.memory_space<vmem>>, vector<128x128xbf16>
    %cst = arith.constant dense<0.000000e+00> : vector<16x128xf32>
    %2 = tpu.matmul %0, %1, %cst {dimension_numbers = #tpu.dot_dimension_numbers<[1], [0], [0], [1], [0, 0, 1, 1], [], []>} : vector<16x128xbf16>, vector<128x128xbf16>, vector<16x128xf32> -> vector<16x128xf32>
    %c0_3 = arith.constant 0 : index
    %c0_4 = arith.constant 0 : index
    %3 = vector.load %arg3[%c0_3, %c0_4] : memref<1x128xf32, #tpu.memory_space<vmem>>, vector<1x128xf32>
    %4 = vector.broadcast %3 : vector<1x128xf32> to vector<16x128xf32>
    %5 = arith.addf %2, %4 : vector<16x128xf32>
    %cst_5 = arith.constant 0.000000e+00 : f32
    %6 = vector.broadcast %cst_5 : f32 to vector<16x128xf32>
    %7 = arith.maximumf %5, %6 : vector<16x128xf32>
    %c0_6 = arith.constant 0 : index
    %c0_7 = arith.constant 0 : index
    %8 = vector.load %arg6[%c0_6, %c0_7] : memref<16x128xf32, #tpu.memory_space<vmem>>, vector<16x128xf32>
    tpu.vector_store %arg6[%c0_6, %c0_7], %7 {strides = array<i32>} : memref<16x128xf32, #tpu.memory_space<vmem>>, vector<16x128xf32>,
    %9 = arith.truncf %7 : vector<16x128xf32> to vector<16x128xbf16>
    %c0_8 = arith.constant 0 : index
    %c0_9 = arith.constant 0 : index
    %10 = vector.load %arg4[%c0_8, %c0_9] : memref<128x128xbf16, #tpu.memory_space<vmem>>, vector<128x128xbf16>
    %cst_10 = arith.constant dense<0.000000e+00> : vector<16x128xf32>
    %11 = tpu.matmul %9, %10, %cst_10 {dimension_numbers = #tpu.dot_dimension_numbers<[1], [0], [0], [1], [0, 0, 1, 1], [], []>} : vector<16x128xbf16>, vector<128x128xbf16>, vector<16x128xf32> -> vector<16x128xf32>
    %c0_11 = arith.constant 0 : index
    %c0_12 = arith.constant 0 : index
    %12 = vector.load %arg5[%c0_11, %c0_12] : memref<1x128xf32, #tpu.memory_space<vmem>>, vector<1x128xf32>
    %13 = vector.broadcast %12 : vector<1x128xf32> to vector<16x128xf32>
    %14 = arith.addf %11, %13 : vector<16x128xf32>
    %cst_13 = arith.constant 0.000000e+00 : f32
    %15 = vector.broadcast %cst_13 : f32 to vector<16x128xf32>
    %16 = arith.subf %15, %14 : vector<16x128xf32>
    %17 = math.exp %16 : vector<16x128xf32>
    %cst_14 = arith.constant 1.000000e+00 : f32
    %18 = vector.broadcast %cst_14 : f32 to vector<16x128xf32>
    %19 = arith.addf %18, %17 : vector<16x128xf32>
    %20 = tpu.reciprocal %19 {approx = true} : vector<16x128xf32> -> vector<16x128xf32>
    %c0_15 = arith.constant 0 : index
    %c0_16 = arith.constant 0 : index
    %21 = vector.load %arg7[%c0_15, %c0_16] : memref<16x128xf32, #tpu.memory_space<vmem>>, vector<16x128xf32>
    tpu.vector_store %arg7[%c0_15, %c0_16], %20 {strides = array<i32>} : memref<16x128xf32, #tpu.memory_space<vmem>>, vector<16x128xf32>,
    return
  }
  func.func @transform_0(%arg0: i32) -> (i32, i32) {
    %c0_i32 = arith.constant 0 : i32
    %c0_i32_0 = arith.constant 0 : i32
    return %arg0, %c0_i32 : i32, i32
  }
  func.func @transform_1(%arg0: i32) -> (i32, i32) {
    %c0_i32 = arith.constant 0 : i32
    %c0_i32_0 = arith.constant 0 : i32
    %c0_i32_1 = arith.constant 0 : i32
    return %c0_i32, %c0_i32_0 : i32, i32
  }
  func.func @transform_2(%arg0: i32) -> (i32, i32) {
    %c0_i32 = arith.constant 0 : i32
    %c0_i32_0 = arith.constant 0 : i32
    %c0_i32_1 = arith.constant 0 : i32
    return %c0_i32, %c0_i32_0 : i32, i32
  }
  func.func @transform_3(%arg0: i32) -> (i32, i32) {
    %c0_i32 = arith.constant 0 : i32
    %c0_i32_0 = arith.constant 0 : i32
    %c0_i32_1 = arith.constant 0 : i32
    return %c0_i32, %c0_i32_0 : i32, i32
  }
  func.func @transform_4(%arg0: i32) -> (i32, i32) {
    %c0_i32 = arith.constant 0 : i32
    %c0_i32_0 = arith.constant 0 : i32
    %c0_i32_1 = arith.constant 0 : i32
    return %c0_i32, %c0_i32_0 : i32, i32
  }
  func.func @transform_5(%arg0: i32) -> (i32, i32) {
    %c0_i32 = arith.constant 0 : i32
    %c0_i32_0 = arith.constant 0 : i32
    return %arg0, %c0_i32 : i32, i32
  }
  func.func @transform_6(%arg0: i32) -> (i32, i32) {
    %c0_i32 = arith.constant 0 : i32
    %c0_i32_0 = arith.constant 0 : i32
    return %arg0, %c0_i32 : i32, i32
  }
}

</mosaic_0001>

<bundles_post_ra>
// kernel: _forward_impl.1
= control target key start
LH: loop header
LB: loop body
LE: loop exit
PB: predicated region body
PF: predicated region fallthrough
CT: control target
= control target key end

     0   :  { %12 = vsyncpa [#allocation3], 0  ;;  %v462_v1 = vmov 0.0   ;;  %vm463_vm0 = vmmov 0   ;;  %s590_s0 = inlined_call_operand.vmem [shape: bf16[16,128], index: 0, kind: input, shape index: {}]   ;;  %s591_s1 = inlined_call_operand.vmem [shape: bf16[128,128], index: 1, kind: input, shape index: {}]   ;;  %s592_s2 = inlined_call_operand.vmem [shape: f32[1,128], index: 2, kind: input, shape index: {}]   ;;  %s593_s3 = inlined_call_operand.vmem [shape: bf16[128,128], index: 3, kind: input, shape index: {}]   ;;  %s594_s4 = inlined_call_operand.vmem [shape: f32[1,128], index: 4, kind: input, shape index: {}]   ;;  %s595_s5 = inlined_call_operand.hbm [shape: f32[16,128], index: 5, kind: output, shape index: {0}]   ;;  %s596_s6 = inlined_call_operand.hbm [shape: f32[16,128], index: 6, kind: output, shape index: {1}]  }
   0x1   :  { %v389_v0 = vld [vmem:[%s591_s1] sm:$0xff]   ;;  %343 = vmatprep.subr.bf16.mxu0 %v462_v1  ;;  %363 = vmatprep.subr.bf16.mxu1 %v462_v1  ;;  %v390_v2 = vld [vmem:[%s591_s1 + $0x8] sm:$0xff]   ;;  %v391_v3 = vld [vmem:[%s591_s1 + $0x10] sm:$0xff]  }
   0x2   :  { %344 = vmatpush3.bf16.msra.mxu0 %v389_v0  ;;  %359 = vmatprep.mubr.msk.bf16.mxu0 %vm463_vm0, %v462_v1  ;;  %v398_v4 = vld [vmem:[%s593_s3] sm:$0xff]   ;;  %v392_v5 = vld [vmem:[%s591_s1 + $0x18] sm:$0xff]   ;;  %v399_v6 = vld [vmem:[%s593_s3 + $0x8] sm:$0xff]  }
   0x3   :  { %345 = vmatprep.subr.bf16.mxu0 %v462_v1  ;;  %379 = vmatprep.mubr.msk.bf16.mxu1 %vm463_vm0, %v462_v1  ;;  %v393_v7 = vld [vmem:[%s591_s1 + $0x20] sm:$0xff]   ;;  %v400_v8 = vld [vmem:[%s593_s3 + $0x10] sm:$0xff]  }
   0x4   :  { %364 = vmatpush3.bf16.msra.mxu1 %v398_v4 }
   0x5   :  { %365 = vmatprep.subr.bf16.mxu1 %v462_v1 }
   0x6   :  { %346 = vmatpush3.bf16.msra.mxu0 %v390_v2 }
   0x7   :  { %347 = vmatprep.subr.bf16.mxu0 %v462_v1 }
   0x8   :  { %366 = vmatpush3.bf16.msra.mxu1 %v399_v6 }
   0x9   :  { %367 = vmatprep.subr.bf16.mxu1 %v462_v1 }
   0xa   :  { %348 = vmatpush3.bf16.msra.mxu0 %v391_v3 }
   0xb   :  { %349 = vmatprep.subr.bf16.mxu0 %v462_v1 }
   0xe   :  { %350 = vmatpush3.bf16.msra.mxu0 %v392_v5 }
   0xf   :  { %351 = vmatprep.subr.bf16.mxu0 %v462_v1 }
  0x10   :  { %13 = vsyncpa [#allocation5], 0  ;;  %v394_v9 = vld [vmem:[%s591_s1 + $0x28] sm:$0xff]   ;;  %368 = vmatpush3.bf16.msra.mxu1 %v400_v8  ;;  %v401_v10 = vld [vmem:[%s593_s3 + $0x18] sm:$0xff]  }
  0x11   :  { %369 = vmatprep.subr.bf16.mxu1 %v462_v1  ;;  %v395_v11 = vld [vmem:[%s591_s1 + $0x30] sm:$0xff]   ;;  %v402_v12 = vld [vmem:[%s593_s3 + $0x20] sm:$0xff]   ;;  %v396_v13 = vld [vmem:[%s591_s1 + $0x38] sm:$0xff]  }
  0x12   :  { %352 = vmatpush3.bf16.msra.mxu0 %v393_v7  ;;  %v403_v14 = vld [vmem:[%s593_s3 + $0x28] sm:$0xff]   ;;  %v397_v15 = vld [vmem:[%s590_s0] sm:$0xff]   ;;  %v404_v16 = vld [vmem:[%s593_s3 + $0x30] sm:$0xff]   ;;  %s464_s0 = smov [#allocation2]  }
  0x13   :  { %353 = vmatprep.subr.bf16.mxu0 %v462_v1  ;;  %v405_v17 = vld [vmem:[%s593_s3 + $0x38] sm:$0xff]   ;;  %v306_v18 = vld [vmem:[%s592_s2] ss:$0 sm:$0xff]  ;;  %s279_s8 = sshll.u32 %s464_s0, 4  ;;  %s280_s8 = int_to_ptr.vmem [resolvable:$true] %s279_s8 }
  0x14   :  { %370 = vmatpush3.bf16.msra.mxu1 %v401_v10  ;;  %s414_s3 = scalar_lea.vmem %s280_s8, 256  ;;  %p419_p1 = scmp.lt.s32.totalorder %s280_s8, %s280_s8 }
  0x15   :  { %371 = vmatprep.subr.bf16.mxu1 %v462_v1  ;;  %p415_p0 = scmp.ne.s32.totalorder %s280_s8, %s414_s3  ;;  %p420_p2 = scmp.lt.s32.totalorder %s414_s3, %s414_s3 }
  0x16   :  { %354 = vmatpush3.bf16.msra.mxu0 %v394_v9 }
  0x17   :  { %355 = vmatprep.subr.bf16.mxu0 %v462_v1  ;;  %p421_p3 = por %p420_p2, %p419_p1 }
  0x18   :  { %372 = vmatpush3.bf16.msra.mxu1 %v402_v12 }
  0x19   :  { %373 = vmatprep.subr.bf16.mxu1 %v462_v1  ;;  %p422_p4 = pnand %p421_p3, %p415_p0 }
  0x1a   :  { %356 = vmatpush3.bf16.msra.mxu0 %v395_v11 }
  0x1b   :  { %357 = vmatprep.subr.bf16.mxu0 %v462_v1 }
  0x1c   :  { %374 = vmatpush3.bf16.msra.mxu1 %v403_v14 }
  0x1d   :  { %375 = vmatprep.subr.bf16.mxu1 %v462_v1 }
  0x1e   :  { %358 = vmatpush3.bf16.msra.mxu0 %v396_v13 }
  0x20   :  { %376 = vmatpush3.bf16.msra.mxu1 %v404_v16 }
  0x21   :  { %360 = vmatmul.mubr.bf16.vlgmr.msra.gmra.mrb[0].mxu0 %v397_v15  ;;  %377 = vmatprep.subr.bf16.mxu1 %v462_v1 }
  0x24   :  { %378 = vmatpush3.bf16.msra.mxu1 %v405_v17 }
  0xf4   :  { %v138_v19 = vpop.f32.mrb[0].mxu0 }
  0xf5   :  { %v139_v20 = vadd.f32 %v306_v18, %v138_v19  ;;  %v361_v21 = vpop.f32.mrb[1].mxu0 }
  0xf6   :  { %v141_v22 = vpop.f32.mrb[2].mxu0 }
  0xf7   :  { %v145_v23 = vmax.f32 %v139_v20, 0.0  ;;  %v142_v24 = vadd.f32 %v306_v18, %v141_v22  ;;  %v362_v25 = vpop.f32.mrb[3].mxu0 }
  0xf9   :  { %147 = vst [vmem:[#allocation2] sm:$0xff] %v145_v23  ;;  %v146_v26 = vmax.f32 %v142_v24, 0.0 }
  0xfb   :  { %148 = vst [vmem:[#allocation2 + $0x8] sm:$0xff] %v146_v26  ;;  %v149_v27 = vpack.c.bf16 %v146_v26, %v145_v23 }
  0xfd   :  { %380 = vmatmul.mubr.bf16.vlgmr.msra.gmra.mrb[0].mxu1 %v149_v27 }
  0xfe   :  { %425 = shalt.err (!%p422_p4)
}
  0xff   :  { %s426_s10 = scalar_lea.hbm %s595_s5, 256 }
 0x100   :  { %p427_p5 = scmp.ne.s32.totalorder %s595_s5, %s426_s10  ;;  %p430_p6 = scmp.lt.u32.totalorder %s426_s10, %s595_s5 }
 0x102   :  { %p432_p7 = pnand %p430_p6, %p427_p5 }
 0x104   :  { %435 = shalt.err (!%p432_p7)
}
 0x105   :  { %s465_s15 = smov 128   ;;  %s466_s16 = smov 8   ;;  %v316_v28 = vld [vmem:[%s594_s4] ss:$0 sm:$0xff] }
 0x106   :  { %285 = dma.vmem_to_hbm [thread:$0]  %s280_s8, 256, %s595_s5, [#allocation3], %s465_s15, %s465_s15, %s466_s16  }
 0x107   :  { %s467_s5 = smov [#allocation4]  }
 0x108   :  { %s291_s4 = sshll.u32 %s467_s5, 4  ;;  %s292_s4 = int_to_ptr.vmem [resolvable:$true] %s291_s4 }
 0x109   :  { %s436_s21 = scalar_lea.vmem %s292_s4, 256  ;;  %p441_p9 = scmp.lt.s32.totalorder %s292_s4, %s292_s4 }
 0x10a   :  { %p437_p8 = scmp.ne.s32.totalorder %s292_s4, %s436_s21  ;;  %p442_p10 = scmp.lt.s32.totalorder %s436_s21, %s436_s21 }
 0x10c   :  { %p443_p11 = por %p442_p10, %p441_p9 }
 0x10e   :  { %p444_p12 = pnand %p443_p11, %p437_p8 }
 0x1d0   :  { %v255_v29 = vpop.f32.mrb[0].mxu1 }
 0x1d1   :  { %v256_v30 = vadd.f32 %v316_v28, %v255_v29  ;;  %v381_v31 = vpop.f32.mrb[1].mxu1 }
 0x1d2   :  { %v258_v32 = vpop.f32.mrb[2].mxu1 }
 0x1d3   :  { %v262_v33 = vsub.f32 0.0, %v256_v30  ;;  %v259_v34 = vadd.f32 %v316_v28, %v258_v32  ;;  %v382_v35 = vpop.f32.mrb[3].mxu1 }
 0x1d5   :  { %v264_v36 = vmul.f32 1.442695, %v262_v33  ;;  %v263_v37 = vsub.f32 0.0, %v259_v34 }
 0x1d7   :  { %406 = vpow2.f32 %v264_v36  ;;  %v266_v38 = vmul.f32 1.442695, %v263_v37 }
 0x1d9   :  { %408 = vpow2.f32 %v266_v38 }
 0x1e1   :  { %v407_v39 = vpop.eup %406 }
 0x1e2   :  { %v268_v40 = vadd.f32 1.0, %v407_v39 }
 0x1e3   :  { %v409_v41 = vpop.eup %408 }
 0x1e4   :  { %410 = vrcp.f32 %v268_v40  ;;  %v269_v42 = vadd.f32 1.0, %v409_v41 }
 0x1e6   :  { %412 = vrcp.f32 %v269_v42 }
 0x1ee   :  { %v411_v43 = vpop.eup %410 }
 0x1ef   :  { %272 = vst [vmem:[#allocation4] sm:$0xff] %v411_v43 }
 0x1f0   :  { %v413_v44 = vpop.eup %412 }
 0x1f1   :  { %273 = vst [vmem:[#allocation4 + $0x8] sm:$0xff] %v413_v44 }
 0x1f2   :  { %447 = shalt.err (!%p444_p12)
}
 0x1f3   :  { %s448_s24 = scalar_lea.hbm %s596_s6, 256 }
 0x1f4   :  { %p449_p13 = scmp.ne.s32.totalorder %s596_s6, %s448_s24  ;;  %p452_p0 = scmp.lt.u32.totalorder %s448_s24, %s596_s6 }
 0x1f6   :  { %p454_p1 = pnand %p452_p0, %p449_p13 }
 0x1f8   :  { %457 = shalt.err (!%p454_p1)
}
 0x1f9   :  { %297 = dma.vmem_to_hbm [thread:$0]  %s292_s4, 256, %s596_s6, [#allocation5], %s465_s15, %s465_s15, %s466_s16  }
 0x1fa   :  { %458 = dma.done.wait [#allocation3], 256  }
 0x1fb   :  { %459 = vsyncadd [#allocation3], 4294967040 }
 0x1fc   :  { %460 = dma.done.wait [#allocation5], 256  }
 0x1fd   :  { %461 = vsyncadd [#allocation5], 4294967040 }
 0x1fe   :  { %304 = vsyncpa [#allocation3], 1 }
 0x1ff   :  { %305 = vsyncpa [#allocation5], 1 }

// kernel: _forward_impl.1
= control target key start
LH: loop header
LB: loop body
LE: loop exit
PB: predicated region body
PF: predicated region fallthrough
CT: control target
= control target key end

     0   :  { %12 = vsyncpa [#allocation3], 0  ;;  %v462_v1 = vmov 0.0   ;;  %vm463_vm0 = vmmov 0   ;;  %s590_s0 = inlined_call_operand.vmem [shape: bf16[16,128], index: 0, kind: input, shape index: {}]   ;;  %s591_s1 = inlined_call_operand.vmem [shape: bf16[128,128], index: 1, kind: input, shape index: {}]   ;;  %s592_s2 = inlined_call_operand.vmem [shape: f32[1,128], index: 2, kind: input, shape index: {}]   ;;  %s593_s3 = inlined_call_operand.vmem [shape: bf16[128,128], index: 3, kind: input, shape index: {}]   ;;  %s594_s4 = inlined_call_operand.vmem [shape: f32[1,128], index: 4, kind: input, shape index: {}]   ;;  %s595_s5 = inlined_call_operand.hbm [shape: f32[16,128], index: 5, kind: output, shape index: {0}]   ;;  %s596_s6 = inlined_call_operand.hbm [shape: f32[16,128], index: 6, kind: output, shape index: {1}]  }
   0x1   :  { %v389_v0 = vld [vmem:[%s591_s1] sm:$0xff]   ;;  %343 = vmatprep.subr.bf16.mxu0 %v462_v1  ;;  %363 = vmatprep.subr.bf16.mxu1 %v462_v1  ;;  %v390_v2 = vld [vmem:[%s591_s1 + $0x8] sm:$0xff]   ;;  %v391_v3 = vld [vmem:[%s591_s1 + $0x10] sm:$0xff]  }
   0x2   :  { %344 = vmatpush3.bf16.msra.mxu0 %v389_v0  ;;  %359 = vmatprep.mubr.msk.bf16.mxu0 %vm463_vm0, %v462_v1  ;;  %v398_v4 = vld [vmem:[%s593_s3] sm:$0xff]   ;;  %v392_v5 = vld [vmem:[%s591_s1 + $0x18] sm:$0xff]   ;;  %v399_v6 = vld [vmem:[%s593_s3 + $0x8] sm:$0xff]  }
   0x3   :  { %345 = vmatprep.subr.bf16.mxu0 %v462_v1  ;;  %379 = vmatprep.mubr.msk.bf16.mxu1 %vm463_vm0, %v462_v1  ;;  %v393_v7 = vld [vmem:[%s591_s1 + $0x20] sm:$0xff]   ;;  %v400_v8 = vld [vmem:[%s593_s3 + $0x10] sm:$0xff]  }
   0x4   :  { %364 = vmatpush3.bf16.msra.mxu1 %v398_v4 }
   0x5   :  { %365 = vmatprep.subr.bf16.mxu1 %v462_v1 }
   0x6   :  { %346 = vmatpush3.bf16.msra.mxu0 %v390_v2 }
   0x7   :  { %347 = vmatprep.subr.bf16.mxu0 %v462_v1 }
   0x8   :  { %366 = vmatpush3.bf16.msra.mxu1 %v399_v6 }
   0x9   :  { %367 = vmatprep.subr.bf16.mxu1 %v462_v1 }
   0xa   :  { %348 = vmatpush3.bf16.msra.mxu0 %v391_v3 }
   0xb   :  { %349 = vmatprep.subr.bf16.mxu0 %v462_v1 }
   0xe   :  { %350 = vmatpush3.bf16.msra.mxu0 %v392_v5 }
   0xf   :  { %351 = vmatprep.subr.bf16.mxu0 %v462_v1 }
  0x10   :  { %13 = vsyncpa [#allocation5], 0  ;;  %v394_v9 = vld [vmem:[%s591_s1 + $0x28] sm:$0xff]   ;;  %368 = vmatpush3.bf16.msra.mxu1 %v400_v8  ;;  %v401_v10 = vld [vmem:[%s593_s3 + $0x18] sm:$0xff]  }
  0x11   :  { %369 = vmatprep.subr.bf16.mxu1 %v462_v1  ;;  %v395_v11 = vld [vmem:[%s591_s1 + $0x30] sm:$0xff]   ;;  %v402_v12 = vld [vmem:[%s593_s3 + $0x20] sm:$0xff]   ;;  %v396_v13 = vld [vmem:[%s591_s1 + $0x38] sm:$0xff]  }
  0x12   :  { %352 = vmatpush3.bf16.msra.mxu0 %v393_v7  ;;  %v403_v14 = vld [vmem:[%s593_s3 + $0x28] sm:$0xff]   ;;  %v397_v15 = vld [vmem:[%s590_s0] sm:$0xff]   ;;  %v404_v16 = vld [vmem:[%s593_s3 + $0x30] sm:$0xff]   ;;  %s464_s0 = smov [#allocation2]  }
  0x13   :  { %353 = vmatprep.subr.bf16.mxu0 %v462_v1  ;;  %v405_v17 = vld [vmem:[%s593_s3 + $0x38] sm:$0xff]   ;;  %v306_v18 = vld [vmem:[%s592_s2] ss:$0 sm:$0xff]  ;;  %s279_s8 = sshll.u32 %s464_s0, 4  ;;  %s280_s8 = int_to_ptr.vmem [resolvable:$true] %s279_s8 }
  0x14   :  { %370 = vmatpush3.bf16.msra.mxu1 %v401_v10  ;;  %s414_s3 = scalar_lea.vmem %s280_s8, 256  ;;  %p419_p1 = scmp.lt.s32.totalorder %s280_s8, %s280_s8 }
  0x15   :  { %371 = vmatprep.subr.bf16.mxu1 %v462_v1  ;;  %p415_p0 = scmp.ne.s32.totalorder %s280_s8, %s414_s3  ;;  %p420_p2 = scmp.lt.s32.totalorder %s414_s3, %s414_s3 }
  0x16   :  { %354 = vmatpush3.bf16.msra.mxu0 %v394_v9 }
  0x17   :  { %355 = vmatprep.subr.bf16.mxu0 %v462_v1  ;;  %p421_p3 = por %p420_p2, %p419_p1 }
  0x18   :  { %372 = vmatpush3.bf16.msra.mxu1 %v402_v12 }
  0x19   :  { %373 = vmatprep.subr.bf16.mxu1 %v462_v1  ;;  %p422_p4 = pnand %p421_p3, %p415_p0 }
  0x1a   :  { %356 = vmatpush3.bf16.msra.mxu0 %v395_v11 }
  0x1b   :  { %357 = vmatprep.subr.bf16.mxu0 %v462_v1 }
  0x1c   :  { %374 = vmatpush3.bf16.msra.mxu1 %v403_v14 }
  0x1d   :  { %375 = vmatprep.subr.bf16.mxu1 %v462_v1 }
  0x1e   :  { %358 = vmatpush3.bf16.msra.mxu0 %v396_v13 }
  0x20   :  { %376 = vmatpush3.bf16.msra.mxu1 %v404_v16 }
  0x21   :  { %360 = vmatmul.mubr.bf16.vlgmr.msra.gmra.mrb[0].mxu0 %v397_v15  ;;  %377 = vmatprep.subr.bf16.mxu1 %v462_v1 }
  0x24   :  { %378 = vmatpush3.bf16.msra.mxu1 %v405_v17 }
  0xf4   :  { %v138_v19 = vpop.f32.mrb[0].mxu0 }
  0xf5   :  { %v139_v20 = vadd.f32 %v306_v18, %v138_v19  ;;  %v361_v21 = vpop.f32.mrb[1].mxu0 }
  0xf6   :  { %v141_v22 = vpop.f32.mrb[2].mxu0 }
  0xf7   :  { %v145_v23 = vmax.f32 %v139_v20, 0.0  ;;  %v142_v24 = vadd.f32 %v306_v18, %v141_v22  ;;  %v362_v25 = vpop.f32.mrb[3].mxu0 }
  0xf9   :  { %147 = vst [vmem:[#allocation2] sm:$0xff] %v145_v23  ;;  %v146_v26 = vmax.f32 %v142_v24, 0.0 }
  0xfb   :  { %148 = vst [vmem:[#allocation2 + $0x8] sm:$0xff] %v146_v26  ;;  %v149_v27 = vpack.c.bf16 %v146_v26, %v145_v23 }
  0xfd   :  { %380 = vmatmul.mubr.bf16.vlgmr.msra.gmra.mrb[0].mxu1 %v149_v27 }
  0xfe   :  { %425 = shalt.err (!%p422_p4)
}
  0xff   :  { %s426_s10 = scalar_lea.hbm %s595_s5, 256 }
 0x100   :  { %p427_p5 = scmp.ne.s32.totalorder %s595_s5, %s426_s10  ;;  %p430_p6 = scmp.lt.u32.totalorder %s426_s10, %s595_s5 }
 0x102   :  { %p432_p7 = pnand %p430_p6, %p427_p5 }
 0x104   :  { %435 = shalt.err (!%p432_p7)
}
 0x105   :  { %s465_s15 = smov 128   ;;  %s466_s16 = smov 8   ;;  %v316_v28 = vld [vmem:[%s594_s4] ss:$0 sm:$0xff] }
 0x106   :  { %285 = dma.vmem_to_hbm [thread:$0]  %s280_s8, 256, %s595_s5, [#allocation3], %s465_s15, %s465_s15, %s466_s16  }
 0x107   :  { %s467_s5 = smov [#allocation4]  }
 0x108   :  { %s291_s4 = sshll.u32 %s467_s5, 4  ;;  %s292_s4 = int_to_ptr.vmem [resolvable:$true] %s291_s4 }
 0x109   :  { %s436_s21 = scalar_lea.vmem %s292_s4, 256  ;;  %p441_p9 = scmp.lt.s32.totalorder %s292_s4, %s292_s4 }
 0x10a   :  { %p437_p8 = scmp.ne.s32.totalorder %s292_s4, %s436_s21  ;;  %p442_p10 = scmp.lt.s32.totalorder %s436_s21, %s436_s21 }
 0x10c   :  { %p443_p11 = por %p442_p10, %p441_p9 }
 0x10e   :  { %p444_p12 = pnand %p443_p11, %p437_p8 }
 0x1d0   :  { %v255_v29 = vpop.f32.mrb[0].mxu1 }
 0x1d1   :  { %v256_v30 = vadd.f32 %v316_v28, %v255_v29  ;;  %v381_v31 = vpop.f32.mrb[1].mxu1 }
 0x1d2   :  { %v258_v32 = vpop.f32.mrb[2].mxu1 }
 0x1d3   :  { %v262_v33 = vsub.f32 0.0, %v256_v30  ;;  %v259_v34 = vadd.f32 %v316_v28, %v258_v32  ;;  %v382_v35 = vpop.f32.mrb[3].mxu1 }
 0x1d5   :  { %v264_v36 = vmul.f32 1.442695, %v262_v33  ;;  %v263_v37 = vsub.f32 0.0, %v259_v34 }
 0x1d7   :  { %406 = vpow2.f32 %v264_v36  ;;  %v266_v38 = vmul.f32 1.442695, %v263_v37 }
 0x1d9   :  { %408 = vpow2.f32 %v266_v38 }
 0x1e1   :  { %v407_v39 = vpop.eup %406 }
 0x1e2   :  { %v268_v40 = vadd.f32 1.0, %v407_v39 }
 0x1e3   :  { %v409_v41 = vpop.eup %408 }
 0x1e4   :  { %410 = vrcp.f32 %v268_v40  ;;  %v269_v42 = vadd.f32 1.0, %v409_v41 }
 0x1e6   :  { %412 = vrcp.f32 %v269_v42 }
 0x1ee   :  { %v411_v43 = vpop.eup %410 }
 0x1ef   :  { %272 = vst [vmem:[#allocation4] sm:$0xff] %v411_v43 }
 0x1f0   :  { %v413_v44 = vpop.eup %412 }
 0x1f1   :  { %273 = vst [vmem:[#allocation4 + $0x8] sm:$0xff] %v413_v44 }
 0x1f2   :  { %447 = shalt.err (!%p444_p12)
}
 0x1f3   :  { %s448_s24 = scalar_lea.hbm %s596_s6, 256 }
 0x1f4   :  { %p449_p13 = scmp.ne.s32.totalorder %s596_s6, %s448_s24  ;;  %p452_p0 = scmp.lt.u32.totalorder %s448_s24, %s596_s6 }
 0x1f6   :  { %p454_p1 = pnand %p452_p0, %p449_p13 }
 0x1f8   :  { %457 = shalt.err (!%p454_p1)
}
 0x1f9   :  { %297 = dma.vmem_to_hbm [thread:$0]  %s292_s4, 256, %s596_s6, [#allocation5], %s465_s15, %s465_s15, %s466_s16  }
 0x1fa   :  { %458 = dma.done.wait [#allocation3], 256  }
 0x1fb   :  { %459 = vsyncadd [#allocation3], 4294967040 }
 0x1fc   :  { %460 = dma.done.wait [#allocation5], 256  }
 0x1fd   :  { %461 = vsyncadd [#allocation5], 4294967040 }
 0x1fe   :  { %304 = vsyncpa [#allocation3], 1 }
 0x1ff   :  { %305 = vsyncpa [#allocation5], 1 }

</bundles_post_ra>
